<compile_context>
chip_gen: v7x
topology: tpu7x:2x2x1
jax: 0.10.0
libtpu: 0.0.40
codegen_flags: <defaults>
</compile_context>

<pallas_src>
import functools

import jax
import jax.numpy as jnp
from jax.experimental import pallas as pl
from jax.experimental.pallas import tpu as pltpu

HIDDEN = 250        # encoder hidden size (nn.Linear(250, 24))
LATENT = 24         # self.latent_size = 24
K_PAD = 256         # contraction dim padded 250 -> 256 (8,128)-aligned
LANE = 128          # lane width; outputs are lane-dense 128-wide
TILE_M_MAX = 256    # batch tile (fits VMEM comfortably on v5e/v6e/v7x)
BATCH = 4           # small synthetic batch for the demo


def rsample_kernel(z_ref, w_ref, b_ref, eps_ref, zout_ref, klp_ref,
                   *, true_batch, tile_m):
    """One batch tile of HierVAE.rsample (perturb=True).

    z_mean    = z @ W_mean + b_mean
    z_log_var = -|z @ W_var + b_var|
    kl_terms  = 1 + z_log_var - z_mean^2 - exp(z_log_var)   (summed in wrapper)
    z_out     = z_mean + exp(z_log_var / 2) * eps
    """
    z = z_ref[...]                                            # (tile_m, 256) f32

    # Single fused MXU matmul; mean block in lanes [0,128), var block in [128,256).
    y = jnp.dot(z, w_ref[...], preferred_element_type=jnp.float32) + b_ref[...]
    z_mean = y[:, :LANE]                                      # vreg-aligned slice
    z_log_var = -jnp.abs(y[:, LANE:])                         # vreg-aligned slice

    # One EUP exp: exp(lv) == exp(lv/2)^2.
    e_half = jnp.exp(0.5 * z_log_var)
    exp_lv = e_half * e_half

    # Padded lanes: weight/bias cols are 0 -> mean=0, logvar=0 -> term = 0.
    kl_terms = 1.0 + z_log_var - z_mean * z_mean - exp_lv     # (tile_m, 128)

    # Padded rows still see the bias -> mask them out of the KL sum.
    row = (pl.program_id(0) * tile_m
           + jax.lax.broadcasted_iota(jnp.int32, kl_terms.shape, 0))
    kl_terms = jnp.where(row < true_batch, kl_terms, 0.0)

    # Per-tile partial KL as an aligned (8,128) slab (VPU-only reduction:
    # regroup whole (8,128) vreg tiles and add them; no XLU, no carry).
    partial = jnp.sum(kl_terms.reshape(tile_m // 8, 8, LANE), axis=0)
    klp_ref[...] = partial.reshape(1, 8, LANE)

    # Lane-dense (tile_m, 128) store; real latent lives in lanes [0, 24).
    zout_ref[...] = z_mean + e_half * eps_ref[...]


def hier_vae_rsample(root_vecs, w_fused, b_fused, eps, *, tile_m=TILE_M_MAX):
    """root_vecs (B,250) f32 -> (z_vecs (B,24) f32, kl () f32)."""
    B, H = root_vecs.shape

    # Batch tile: multiple of 8, at most tile_m; weights stay VMEM-resident.
    m_tile = min(tile_m, pl.cdiv(B, 8) * 8)
    m_pad = pl.cdiv(B, m_tile) * m_tile
    num_tiles = m_pad // m_tile

    # Zero-pad batch rows and the contraction dim (250 -> 256); eps is padded
    # to the lane-dense 128-wide layout (zeros in padded lanes/rows).
    z_pad = jnp.zeros((m_pad, K_PAD), jnp.float32).at[:B, :H].set(root_vecs)
    eps_pad = jnp.zeros((m_pad, LANE), jnp.float32).at[:B, :LATENT].set(eps)

    kernel = functools.partial(rsample_kernel, true_batch=B, tile_m=m_tile)

    z_out, kl_part = pl.pallas_call(
        kernel,
        out_shape=(
            jax.ShapeDtypeStruct((m_pad, LANE), jnp.float32),
            jax.ShapeDtypeStruct((num_tiles, 8, LANE), jnp.float32),
        ),
        grid_spec=pltpu.PrefetchScalarGridSpec(
            num_scalar_prefetch=0,
            grid=(num_tiles,),
            in_specs=[
                pl.BlockSpec((m_tile, K_PAD), lambda i: (i, 0)),      # root_vecs tile
                pl.BlockSpec((K_PAD, 2 * LANE), lambda i: (0, 0)),    # fused W (resident)
                pl.BlockSpec((1, 2 * LANE), lambda i: (0, 0)),        # fused b (resident)
                pl.BlockSpec((m_tile, LANE), lambda i: (i, 0)),       # eps tile
            ],
            out_specs=(
                pl.BlockSpec((m_tile, LANE), lambda i: (i, 0)),       # z_out tile
                pl.BlockSpec((1, 8, LANE), lambda i: (i, 0, 0)),      # KL partial
            ),
        ),
        compiler_params=pltpu.CompilerParams(
            dimension_semantics=("parallel",)),   # no cross-step carry -> 2 TCs on v7x
    )(z_pad, w_fused, b_fused, eps_pad)

    z_vecs = z_out[:B, :LATENT]
    kl = -0.5 * jnp.sum(kl_part) / B              # true-batch divisor
    return z_vecs, kl


def hier_vae_forward(root_vecs, params, eps, beta):
    """HierVAE.forward equivalent for the provided dense compute.

    # TODO(synk): encoder/decoder message-passing nets are not in the given
    # source; `root_vecs` stands in for the encoder output and the decoder
    # reconstruction loss is omitted, so `total` = beta * kl_div only.
    """
    z_vecs, kl_div = hier_vae_rsample(
        root_vecs, params["w_fused"], params["b_fused"], eps)
    total = beta * kl_div
    return z_vecs, kl_div, total


def init_params(key):
    """nn.Linear(250, 24) x2, plus the fused/padded kernel-side weight.

    PyTorch stores weight as (out, in); we store the transpose (in, out).
    The fused weight is (256, 256): W_mean in lanes [0,24) of the first
    128-lane half, W_var in lanes [0,24) of the second half, contraction dim
    zero-padded 250 -> 256.  Padded bias entries are exactly 0 so padded KL
    lanes cancel (1 + 0 - 0 - exp(0) = 0).
    """
    k1, k2, k3, k4 = jax.random.split(key, 4)
    bound = 1.0 / jnp.sqrt(HIDDEN)
    w_mean = jax.random.uniform(k1, (HIDDEN, LATENT), jnp.float32, -bound, bound)
    b_mean = jax.random.uniform(k2, (1, LATENT), jnp.float32, -bound, bound)
    w_var = jax.random.uniform(k3, (HIDDEN, LATENT), jnp.float32, -bound, bound)
    b_var = jax.random.uniform(k4, (1, LATENT), jnp.float32, -bound, bound)

    w_fused = jnp.zeros((K_PAD, 2 * LANE), jnp.float32)
    w_fused = w_fused.at[:HIDDEN, :LATENT].set(w_mean)
    w_fused = w_fused.at[:HIDDEN, LANE:LANE + LATENT].set(w_var)
    b_fused = jnp.zeros((1, 2 * LANE), jnp.float32)
    b_fused = b_fused.at[:, :LATENT].set(b_mean)
    b_fused = b_fused.at[:, LANE:LANE + LATENT].set(b_var)

    # NOTE: for very large batches on v6e/v7x, casting z_pad/w_fused to bf16
    # (keeping preferred_element_type=f32) halves the HBM stream; kept f32
    # here to match the f32 PyTorch reference bit-closely.
    return {"w_mean": w_mean, "b_mean": b_mean, "w_var": w_var, "b_var": b_var,
            "w_fused": w_fused, "b_fused": b_fused}


def reference_rsample(root_vecs, params, eps):
    """Pure-JAX reference of the PyTorch rsample() for verification."""
    z_mean = root_vecs @ params["w_mean"] + params["b_mean"]
    z_log_var = -jnp.abs(root_vecs @ params["w_var"] + params["b_var"])
    kl = -0.5 * jnp.sum(1.0 + z_log_var - z_mean * z_mean
                        - jnp.exp(z_log_var)) / root_vecs.shape[0]
    z = z_mean + jnp.exp(z_log_var / 2.0) * eps
    return z, kl


if __name__ == "__main__":
    key = jax.random.PRNGKey(0)
    k_params, k_root, k_eps = jax.random.split(key, 3)

    params = init_params(k_params)
    # Synthetic encoder output (stands in for HierMPNEncoder root vectors).
    root_vecs = jax.random.normal(k_root, (BATCH, HIDDEN), jnp.float32)
    # torch.randn_like(z_mean) equivalent, deterministic (kept as an input so
    # the kernel is checkable against the reference; could instead be drawn
    # in-kernel with pltpu.prng_seed + pltpu.stateful_normal).
    eps = jax.random.normal(k_eps, (BATCH, LATENT), jnp.float32)

    beta = 0.1
    z_vecs, kl_div, total = hier_vae_forward(root_vecs, params, eps, beta)
    jax.block_until_ready((z_vecs, kl_div, total))

    # Correctness check against a pure-JAX reference of the PyTorch math.
    z_ref, kl_ref = reference_rsample(root_vecs, params, eps)
    assert z_vecs.shape == (BATCH, LATENT)
    assert jnp.allclose(z_vecs, z_ref, atol=1e-5, rtol=1e-5)
    assert jnp.allclose(kl_div, kl_ref, atol=1e-4, rtol=1e-5)

    print("KERNEL_OK")
</pallas_src>

<mosaic_0001>
module attributes {stable_mosaic.version = 11 : i64} {
  func.func @rsample_kernel(%arg0: i32, %arg1: memref<8x256xf32, #tpu.memory_space<vmem>>, %arg2: memref<256x256xf32, #tpu.memory_space<vmem>>, %arg3: memref<1x256xf32, #tpu.memory_space<vmem>>, %arg4: memref<8x128xf32, #tpu.memory_space<vmem>>, %arg5: memref<8x128xf32, #tpu.memory_space<vmem>>, %arg6: memref<1x8x128xf32, #tpu.memory_space<vmem>>) attributes {dimension_semantics = [#tpu.dimension_semantics<parallel>], iteration_bounds = array<i64: 1>, scalar_prefetch = 0 : i64, scratch_operands = 0 : i64, tpu.core_type = #tpu.core_type<tc>, window_params = [{transform_indices = @transform_0, window_bounds = array<i64: 8, 256>}, {pipeline_mode = #tpu.pipeline_mode<synchronous>, transform_indices = @transform_1, window_bounds = array<i64: 256, 256>}, {pipeline_mode = #tpu.pipeline_mode<synchronous>, transform_indices = @transform_2, window_bounds = array<i64: 1, 256>}, {transform_indices = @transform_3, window_bounds = array<i64: 8, 128>}, {transform_indices = @transform_4, window_bounds = array<i64: 8, 128>}, {transform_indices = @transform_5, window_bounds = array<i64: 1, 8, 128>}]} {
    %c0 = arith.constant 0 : index
    %c0_0 = arith.constant 0 : index
    %0 = vector.load %arg1[%c0, %c0_0] : memref<8x256xf32, #tpu.memory_space<vmem>>, vector<8x256xf32>
    %c0_1 = arith.constant 0 : index
    %c0_2 = arith.constant 0 : index
    %1 = vector.load %arg2[%c0_1, %c0_2] : memref<256x256xf32, #tpu.memory_space<vmem>>, vector<256x256xf32>
    %cst = arith.constant dense<0.000000e+00> : vector<8x256xf32>
    %2 = tpu.matmul %0, %1, %cst {dimension_numbers = #tpu.dot_dimension_numbers<[1], [0], [0], [1], [0, 0, 1, 1], [], []>} : vector<8x256xf32>, vector<256x256xf32>, vector<8x256xf32> -> vector<8x256xf32>
    %c0_3 = arith.constant 0 : index
    %c0_4 = arith.constant 0 : index
    %3 = vector.load %arg3[%c0_3, %c0_4] : memref<1x256xf32, #tpu.memory_space<vmem>>, vector<1x256xf32>
    %4 = vector.broadcast %3 : vector<1x256xf32> to vector<8x256xf32>
    %5 = arith.addf %2, %4 : vector<8x256xf32>
    %6 = vector.extract_strided_slice %5 {offsets = [0, 0], sizes = [8, 128], strides = [1, 1]} : vector<8x256xf32> to vector<8x128xf32>
    %7 = vector.extract_strided_slice %5 {offsets = [0, 128], sizes = [8, 128], strides = [1, 1]} : vector<8x256xf32> to vector<8x128xf32>
    %8 = math.absf %7 : vector<8x128xf32>
    %cst_5 = arith.constant 0.000000e+00 : f32
    %9 = vector.broadcast %cst_5 : f32 to vector<8x128xf32>
    %10 = arith.subf %9, %8 : vector<8x128xf32>
    %cst_6 = arith.constant 5.000000e-01 : f32
    %11 = vector.broadcast %cst_6 : f32 to vector<8x128xf32>
    %12 = arith.mulf %11, %10 : vector<8x128xf32>
    %13 = math.exp %12 : vector<8x128xf32>
    %14 = arith.mulf %13, %13 : vector<8x128xf32>
    %cst_7 = arith.constant 1.000000e+00 : f32
    %15 = vector.broadcast %cst_7 : f32 to vector<8x128xf32>
    %16 = arith.addf %15, %10 : vector<8x128xf32>
    %17 = arith.mulf %6, %6 : vector<8x128xf32>
    %18 = arith.subf %16, %17 : vector<8x128xf32>
    %19 = arith.subf %18, %14 : vector<8x128xf32>
    %c8_i32 = arith.constant 8 : i32
    %20 = arith.muli %arg0, %c8_i32 : i32
    %21 = tpu.iota {dimensions = array<i32: 0>} : vector<8x128xi32>
    %22 = vector.broadcast %20 : i32 to vector<8x128xi32>
    %23 = arith.addi %22, %21 : vector<8x128xi32>
    %c4_i32 = arith.constant 4 : i32
    %24 = vector.broadcast %c4_i32 : i32 to vector<8x128xi32>
    %25 = arith.cmpi slt, %23, %24 : vector<8x128xi32>
    %cst_8 = arith.constant 0.000000e+00 : f32
    %26 = vector.broadcast %cst_8 : f32 to vector<8x128xf32>
    %27 = arith.select %25, %19, %26 : vector<8x128xi1>, vector<8x128xf32>
    %28 = vector.shape_cast %27 : vector<8x128xf32> to vector<1x8x128xf32>
    %cst_9 = arith.constant dense<0.000000e+00> : vector<8x128xf32>
    %29 = vector.multi_reduction <add>, %28, %cst_9 [0] : vector<1x8x128xf32> to vector<8x128xf32>
    %30 = vector.shape_cast %29 : vector<8x128xf32> to vector<1x8x128xf32>
    %c0_10 = arith.constant 0 : index
    %c0_11 = arith.constant 0 : index
    %c0_12 = arith.constant 0 : index
    %31 = vector.load %arg6[%c0_10, %c0_11, %c0_12] : memref<1x8x128xf32, #tpu.memory_space<vmem>>, vector<1x8x128xf32>
    tpu.vector_store %arg6[%c0_10, %c0_11, %c0_12], %30 {strides = array<i32>} : memref<1x8x128xf32, #tpu.memory_space<vmem>>, vector<1x8x128xf32>,
    %c0_13 = arith.constant 0 : index
    %c0_14 = arith.constant 0 : index
    %32 = vector.load %arg4[%c0_13, %c0_14] : memref<8x128xf32, #tpu.memory_space<vmem>>, vector<8x128xf32>
    %33 = arith.mulf %13, %32 : vector<8x128xf32>
    %34 = arith.addf %6, %33 : vector<8x128xf32>
    %c0_15 = arith.constant 0 : index
    %c0_16 = arith.constant 0 : index
    %35 = vector.load %arg5[%c0_15, %c0_16] : memref<8x128xf32, #tpu.memory_space<vmem>>, vector<8x128xf32>
    tpu.vector_store %arg5[%c0_15, %c0_16], %34 {strides = array<i32>} : memref<8x128xf32, #tpu.memory_space<vmem>>, vector<8x128xf32>,
    return
  }
  func.func @transform_0(%arg0: i32) -> (i32, i32) {
    %c0_i32 = arith.constant 0 : i32
    %c0_i32_0 = arith.constant 0 : i32
    return %arg0, %c0_i32 : i32, i32
  }
  func.func @transform_1(%arg0: i32) -> (i32, i32) {
    %c0_i32 = arith.constant 0 : i32
    %c0_i32_0 = arith.constant 0 : i32
    %c0_i32_1 = arith.constant 0 : i32
    return %c0_i32, %c0_i32_0 : i32, i32
  }
  func.func @transform_2(%arg0: i32) -> (i32, i32) {
    %c0_i32 = arith.constant 0 : i32
    %c0_i32_0 = arith.constant 0 : i32
    %c0_i32_1 = arith.constant 0 : i32
    return %c0_i32, %c0_i32_0 : i32, i32
  }
  func.func @transform_3(%arg0: i32) -> (i32, i32) {
    %c0_i32 = arith.constant 0 : i32
    %c0_i32_0 = arith.constant 0 : i32
    return %arg0, %c0_i32 : i32, i32
  }
  func.func @transform_4(%arg0: i32) -> (i32, i32) {
    %c0_i32 = arith.constant 0 : i32
    %c0_i32_0 = arith.constant 0 : i32
    return %arg0, %c0_i32 : i32, i32
  }
  func.func @transform_5(%arg0: i32) -> (i32, i32, i32) {
    %c0_i32 = arith.constant 0 : i32
    %c0_i32_0 = arith.constant 0 : i32
    %c0_i32_1 = arith.constant 0 : i32
    return %arg0, %c0_i32, %c0_i32_0 : i32, i32, i32
  }
}

</mosaic_0001>

<bundles_post_ra>
// kernel: tpu_custom_call.1
= control target key start
LH: loop header
LB: loop body
LE: loop exit
PB: predicated region body
PF: predicated region fallthrough
CT: control target
= control target key end

     0   :  { %11 = vsyncpa [#allocation3], 0  ;;  %s521_s0 = inlined_call_operand.hbm [shape: f32[8,256], index: 0, kind: input, shape index: {}]   ;;  %s522_s1 = inlined_call_operand.hbm [shape: f32[256,256], index: 1, kind: input, shape index: {}]   ;;  %s523_s2 = inlined_call_operand.vmem [shape: f32[1,256], index: 2, kind: input, shape index: {}]   ;;  %s524_s3 = inlined_call_operand.vmem [shape: f32[8,128], index: 3, kind: input, shape index: {}]   ;;  %s525_s4 = inlined_call_operand.hbm [shape: f32[8,128], index: 4, kind: output, shape index: {0}]   ;;  %s526_s5 = inlined_call_operand.hbm [shape: f32[1,8,128], index: 5, kind: output, shape index: {1}]  }
   0x1   :  { %12 = vsyncpa [#allocation6], 0 }
   0x2   :  { %13 = vsyncpa [#allocation4], 0 }
   0x3   :  { %14 = vsyncpa [#allocation9], 0  ;;  %s417_s18 = smov [#allocation2]   ;;  %s418_s20 = smov [#allocation5]  }
   0x4   :  { %s21_s19 = sshll.u32 %s417_s18, 4  ;;  %s30_s21 = sshll.u32 %s418_s20, 4  ;;  %s22_s19 = int_to_ptr.vmem [resolvable:$true] %s21_s19  ;;  %s453_s21 = int_to_ptr.vmem [resolvable:$true] %s30_s21 }
   0x5   :  { %s321_s24 = scalar_lea.hbm %s521_s0, 256 }
   0x6   :  { %p322_p0 = scmp.ne.s32.totalorder %s521_s0, %s321_s24  ;;  %p325_p1 = scmp.lt.u32.totalorder %s321_s24, %s521_s0 }
   0x8   :  { %p327_p2 = pnand %p325_p1, %p322_p0 }
   0xa   :  { %330 = shalt.err (!%p327_p2)
}
   0xb   :  { %s331_s29 = scalar_lea.vmem %s22_s19, 256  ;;  %p336_p4 = scmp.lt.s32.totalorder %s22_s19, %s22_s19 }
   0xc   :  { %p332_p3 = scmp.ne.s32.totalorder %s22_s19, %s331_s29  ;;  %p337_p5 = scmp.lt.s32.totalorder %s331_s29, %s331_s29 }
   0xe   :  { %p338_p6 = por %p337_p5, %p336_p4 }
  0x10   :  { %p339_p7 = pnand %p338_p6, %p332_p3 }
  0x12   :  { %342 = shalt.err (!%p339_p7)
}
  0x13   :  { %24 = dma.hbm_to_vmem [thread:$0]  %s521_s0, 256, %s22_s19, [#allocation3]  }
  0x14   :  { %s343_s9 = scalar_lea.hbm %s522_s1, 8192 }
  0x15   :  { %p344_p8 = scmp.ne.s32.totalorder %s522_s1, %s343_s9  ;;  %p347_p9 = scmp.lt.u32.totalorder %s343_s9, %s522_s1 }
  0x17   :  { %p349_p10 = pnand %p347_p9, %p344_p8 }
  0x19   :  { %352 = shalt.err (!%p349_p10)
}
  0x1a   :  { %s353_s14 = scalar_lea.vmem %s453_s21, 8192  ;;  %p358_p12 = scmp.lt.s32.totalorder %s453_s21, %s453_s21 }
  0x1b   :  { %p354_p11 = scmp.ne.s32.totalorder %s453_s21, %s353_s14  ;;  %p359_p13 = scmp.lt.s32.totalorder %s353_s14, %s353_s14 }
  0x1d   :  { %p360_p0 = por %p359_p13, %p358_p12 }
  0x1f   :  { %p361_p1 = pnand %p360_p0, %p354_p11 }
  0x21   :  { %364 = shalt.err (!%p361_p1)
}
  0x22   :  { %s419_s0 = smov 256   ;;  %s420_s15 = smov 16  }
  0x23   :  { %36 = dma.hbm_to_vmem [thread:$0]  %s522_s1, 8192, %s453_s21, [#allocation6], %s419_s0, %s419_s0, %s420_s15  }
  0x24   :  { %409 = dma.done.wait [#allocation3], 256  }
  0x25   :  { %410 = vsyncadd [#allocation3], 4294967040 }
  0x26   :  { %411 = dma.done.wait [#allocation6], 8192  }
  0x27   :  { %412 = vsyncadd [#allocation6], 4294959104  ;;  %v50_v0 = vld [vmem:[#allocation5 + $0x8] sm:$0xff]  ;;  %v52_v1 = vld [vmem:[#allocation5 + $0x18] sm:$0xff]  ;;  %s422_s22 = smov [#allocation8]  }
  0x28   :  { %v49_v2 = vld [vmem:[#allocation5] sm:$0xff]  ;;  %v249_v3 = vpack.c.bf16 %v52_v1, %v50_v0  ;;  %v51_v4 = vld [vmem:[#allocation5 + $0x10] sm:$0xff]  ;;  %v54_v5 = vld [vmem:[#allocation5 + $0x28] sm:$0xff]  ;;  %s235_s23 = sshll.u32 %s422_s22, 4  ;;  %s490_s23 = int_to_ptr.vmem [resolvable:$true] %s235_s23 }
  0x29   :  { %v56_v6 = vld [vmem:[#allocation5 + $0x38] sm:$0xff]  ;;  %v251_v7 = vpack.c.bf16 %v51_v4, %v49_v2  ;;  %v53_v9 = vld [vmem:[#allocation5 + $0x20] sm:$0xff]  ;;  %v55_v10 = vld [vmem:[#allocation5 + $0x30] sm:$0xff] }
  0x2a   :  { %v253_v8 = vpack.c.bf16 %v56_v6, %v54_v5  ;;  %v58_v11 = vld [vmem:[#allocation5 + $0x48] sm:$0xff]  ;;  %250 = vmatprep.subr.bf16.mxu0 %v249_v3  ;;  %v60_v12 = vld [vmem:[#allocation5 + $0x58] sm:$0xff]  ;;  %v255_v13 = vpack.c.bf16 %v55_v10, %v53_v9  ;;  %v57_v15 = vld [vmem:[#allocation5 + $0x40] sm:$0xff] }
  0x2b   :  { %252 = vmatpush1.bf16.msra.mxu0 %v251_v7  ;;  %v257_v14 = vpack.c.bf16 %v60_v12, %v58_v11  ;;  %v59_v16 = vld [vmem:[#allocation5 + $0x50] sm:$0xff]  ;;  %v62_v17 = vld [vmem:[#allocation5 + $0x68] sm:$0xff]  ;;  %v64_v18 = vld [vmem:[#allocation5 + $0x78] sm:$0xff] }
  0x2c   :  { %254 = vmatprep.subr.bf16.mxu0 %v253_v8  ;;  %v259_v19 = vpack.c.bf16 %v59_v16, %v57_v15  ;;  %v261_v20 = vpack.c.bf16 %v64_v18, %v62_v17  ;;  %v61_v21 = vld [vmem:[#allocation5 + $0x60] sm:$0xff]  ;;  %v63_v22 = vld [vmem:[#allocation5 + $0x70] sm:$0xff]  ;;  %v66_v23 = vld [vmem:[#allocation5 + $0x88] sm:$0xff] }
  0x2d   :  { %v68_v24 = vld [vmem:[#allocation5 + $0x98] sm:$0xff]  ;;  %v263_v25 = vpack.c.bf16 %v63_v22, %v61_v21  ;;  %v65_v27 = vld [vmem:[#allocation5 + $0x80] sm:$0xff]  ;;  %v67_v28 = vld [vmem:[#allocation5 + $0x90] sm:$0xff] }
  0x2e   :  { %v265_v26 = vpack.c.bf16 %v68_v24, %v66_v23  ;;  %v70_v29 = vld [vmem:[#allocation5 + $0xa8] sm:$0xff]  ;;  %v72_v30 = vld [vmem:[#allocation5 + $0xb8] sm:$0xff]  ;;  %v267_v31 = vpack.c.bf16 %v67_v28, %v65_v27  ;;  %v69_v33 = vld [vmem:[#allocation5 + $0xa0] sm:$0xff] }
  0x2f   :  { %256 = vmatpush1.bf16.msra.mxu0 %v255_v13  ;;  %v269_v32 = vpack.c.bf16 %v72_v30, %v70_v29  ;;  %v71_v34 = vld [vmem:[#allocation5 + $0xb0] sm:$0xff]  ;;  %v74_v35 = vld [vmem:[#allocation5 + $0xc8] sm:$0xff]  ;;  %v76_v36 = vld [vmem:[#allocation5 + $0xd8] sm:$0xff] }
  0x30   :  { %258 = vmatprep.subr.bf16.mxu0 %v257_v14  ;;  %v271_v37 = vpack.c.bf16 %v71_v34, %v69_v33  ;;  %v273_v38 = vpack.c.bf16 %v76_v36, %v74_v35  ;;  %v73_v39 = vld [vmem:[#allocation5 + $0xc0] sm:$0xff]  ;;  %v75_v40 = vld [vmem:[#allocation5 + $0xd0] sm:$0xff]  ;;  %v48_v41 = vld [vmem:[#allocation2 + $0x8] sm:$0xff]  ;;  %v115_v34 = vlaneseq }
  0x31   :  { %v78_v42 = vld [vmem:[#allocation5 + $0xe8] sm:$0xff]  ;;  %v80_v43 = vld [vmem:[#allocation5 + $0xf8] sm:$0xff]  ;;  %189 = vmatprep.mubr.f32.mxu0 %v48_v41  ;;  %v275_v44 = vpack.c.bf16 %v75_v40, %v73_v39  ;;  %v77_v46 = vld [vmem:[#allocation5 + $0xe0] sm:$0xff] }
  0x32   :  { %v277_v45 = vpack.c.bf16 %v80_v43, %v78_v42  ;;  %v79_v47 = vld [vmem:[#allocation5 + $0xf0] sm:$0xff]  ;;  %v82_v48 = vld [vmem:[#allocation5 + $0x108] sm:$0xff]  ;;  %v84_v49 = vld [vmem:[#allocation5 + $0x118] sm:$0xff]  ;;  %v116_v35 = vshrl.u32 %v115_v34, 7 }
  0x33   :  { %260 = vmatpush1.bf16.msra.mxu0 %v259_v19  ;;  %v279_v50 = vpack.c.bf16 %v79_v47, %v77_v46  ;;  %v281_v51 = vpack.c.bf16 %v84_v49, %v82_v48  ;;  %v81_v52 = vld [vmem:[#allocation5 + $0x100] sm:$0xff]  ;;  %v83_v53 = vld [vmem:[#allocation5 + $0x110] sm:$0xff]  ;;  %v86_v54 = vld [vmem:[#allocation5 + $0x128] sm:$0xff] }
  0x34   :  { %262 = vmatprep.subr.bf16.mxu0 %v261_v20  ;;  %v88_v55 = vld [vmem:[#allocation5 + $0x138] sm:$0xff]  ;;  %v283_v56 = vpack.c.bf16 %v83_v53, %v81_v52  ;;  %v85_v58 = vld [vmem:[#allocation5 + $0x120] sm:$0xff]  ;;  %v87_v59 = vld [vmem:[#allocation5 + $0x130] sm:$0xff]  ;;  %v121_v36 = vsub.s32 1, %v116_v35  ;;  %vm211_vm0 = vcmp.lt.s32.totalorder %v116_v35, 4 }
  0x35   :  { %v285_v57 = vpack.c.bf16 %v88_v55, %v86_v54  ;;  %v90_v60 = vld [vmem:[#allocation5 + $0x148] sm:$0xff]  ;;  %v92_v61 = vld [vmem:[#allocation5 + $0x158] sm:$0xff]  ;;  %v287_v62 = vpack.c.bf16 %v87_v59, %v85_v58  ;;  %v89_v0 = vld [vmem:[#allocation5 + $0x140] sm:$0xff] }
  0x36   :  { %v289_v63 = vpack.c.bf16 %v92_v61, %v90_v60  ;;  %v91_v1 = vld [vmem:[#allocation5 + $0x150] sm:$0xff]  ;;  %v94_v2 = vld [vmem:[#allocation5 + $0x168] sm:$0xff]  ;;  %v96_v3 = vld [vmem:[#allocation5 + $0x178] sm:$0xff] }
  0x37   :  { %264 = vmatpush1.bf16.msra.mxu0 %v263_v25  ;;  %v291_v4 = vpack.c.bf16 %v91_v1, %v89_v0  ;;  %v293_v5 = vpack.c.bf16 %v96_v3, %v94_v2  ;;  %v93_v6 = vld [vmem:[#allocation5 + $0x160] sm:$0xff]  ;;  %v95_v7 = vld [vmem:[#allocation5 + $0x170] sm:$0xff]  ;;  %v98_v8 = vld [vmem:[#allocation5 + $0x188] sm:$0xff] }
  0x38   :  { %266 = vmatprep.subr.bf16.mxu0 %v265_v26  ;;  %v100_v9 = vld [vmem:[#allocation5 + $0x198] sm:$0xff]  ;;  %v295_v10 = vpack.c.bf16 %v95_v7, %v93_v6  ;;  %v97_v12 = vld [vmem:[#allocation5 + $0x180] sm:$0xff]  ;;  %v99_v13 = vld [vmem:[#allocation5 + $0x190] sm:$0xff] }
  0x39   :  { %v297_v11 = vpack.c.bf16 %v100_v9, %v98_v8  ;;  %v102_v14 = vld [vmem:[#allocation5 + $0x1a8] sm:$0xff]  ;;  %v104_v15 = vld [vmem:[#allocation5 + $0x1b8] sm:$0xff]  ;;  %v299_v16 = vpack.c.bf16 %v99_v13, %v97_v12  ;;  %v101_v18 = vld [vmem:[#allocation5 + $0x1a0] sm:$0xff] }
  0x3a   :  { %v301_v17 = vpack.c.bf16 %v104_v15, %v102_v14  ;;  %v103_v19 = vld [vmem:[#allocation5 + $0x1b0] sm:$0xff]  ;;  %v106_v20 = vld [vmem:[#allocation5 + $0x1c8] sm:$0xff]  ;;  %v108_v21 = vld [vmem:[#allocation5 + $0x1d8] sm:$0xff] }
  0x3b   :  { %268 = vmatpush1.bf16.msra.mxu0 %v267_v31  ;;  %v303_v22 = vpack.c.bf16 %v103_v19, %v101_v18  ;;  %v305_v23 = vpack.c.bf16 %v108_v21, %v106_v20  ;;  %v105_v24 = vld [vmem:[#allocation5 + $0x1c0] sm:$0xff]  ;;  %v107_v25 = vld [vmem:[#allocation5 + $0x1d0] sm:$0xff]  ;;  %v110_v26 = vld [vmem:[#allocation5 + $0x1e8] sm:$0xff] }
  0x3c   :  { %270 = vmatprep.subr.bf16.mxu0 %v269_v32  ;;  %v112_v27 = vld [vmem:[#allocation5 + $0x1f8] sm:$0xff]  ;;  %v307_v28 = vpack.c.bf16 %v107_v25, %v105_v24  ;;  %v109_v30 = vld [vmem:[#allocation5 + $0x1e0] sm:$0xff]  ;;  %v111_v31 = vld [vmem:[#allocation5 + $0x1f0] sm:$0xff] }
  0x3d   :  { %v309_v29 = vpack.c.bf16 %v112_v27, %v110_v26  ;;  %v311_v32 = vpack.c.bf16 %v111_v31, %v109_v30  ;;  %v47_v33 = vld [vmem:[#allocation2] sm:$0xff] }
  0x3e   :  { %v215_v52 = vld [vmem:[%s524_s3] sm:$0xff] }
  0x3f   :  { %272 = vmatpush1.bf16.msra.mxu0 %v271_v37  ;;  %v113_v37 = vld [vmem:[%s523_s2] sm:$0x3]  ;;  %s421_s2 = smov [#allocation7]  }
  0x40   :  { %274 = vmatprep.subr.bf16.mxu0 %v273_v38  ;;  %v117_v38 = vsub.s32 0, %v116_v35  ;;  %v122_v39 = vrot.slane %v113_v37, %v121_v36  ;;  %s225_s21 = sshll.u32 %s421_s2, 4  ;;  %s226_s21 = int_to_ptr.vmem [resolvable:$true] %s225_s21 }
  0x41   :  { %s365_s24 = scalar_lea.vmem %s226_s21, 128  ;;  %p370_p3 = scmp.lt.s32.totalorder %s226_s21, %s226_s21 }
  0x42   :  { %v118_v40 = vrot.slane %v113_v37, %v117_v38  ;;  %p366_p2 = scmp.ne.s32.totalorder %s226_s21, %s365_s24  ;;  %p371_p4 = scmp.lt.s32.totalorder %s365_s24, %s365_s24 }
  0x43   :  { %276 = vmatpush1.bf16.msra.mxu0 %v275_v44 }
  0x44   :  { %278 = vmatprep.subr.bf16.mxu0 %v277_v45  ;;  %p372_p5 = por %p371_p4, %p370_p3 }
  0x46   :  { %p373_p6 = pnand %p372_p5, %p366_p2 }
  0x47   :  { %280 = vmatpush1.bf16.msra.mxu0 %v279_v50 }
  0x48   :  { %282 = vmatprep.subr.bf16.mxu0 %v281_v51 }
  0x4b   :  { %284 = vmatpush1.bf16.msra.mxu0 %v283_v56 }
  0x4c   :  { %286 = vmatprep.subr.bf16.mxu0 %v285_v57 }
  0x4f   :  { %288 = vmatpush1.bf16.msra.mxu0 %v287_v62 }
  0x50   :  { %290 = vmatprep.subr.bf16.mxu0 %v289_v63 }
  0x53   :  { %292 = vmatpush1.bf16.msra.mxu0 %v291_v4 }
  0x54   :  { %294 = vmatprep.subr.bf16.mxu0 %v293_v5 }
  0x57   :  { %296 = vmatpush1.bf16.msra.mxu0 %v295_v10 }
  0x58   :  { %298 = vmatprep.subr.bf16.mxu0 %v297_v11 }
  0x5b   :  { %300 = vmatpush1.bf16.msra.mxu0 %v299_v16 }
  0x5c   :  { %302 = vmatprep.subr.bf16.mxu0 %v301_v17 }
  0x5f   :  { %304 = vmatpush1.bf16.msra.mxu0 %v303_v22 }
  0x60   :  { %306 = vmatprep.subr.bf16.mxu0 %v305_v23 }
  0x63   :  { %308 = vmatpush1.bf16.msra.mxu0 %v307_v28 }
  0x64   :  { %310 = vmatprep.subr.bf16.mxu0 %v309_v29 }
  0x67   :  { %312 = vmatpush1.bf16.msra.mxu0 %v311_v32 }
  0x6a   :  { %190 = vmatmul.mubr.f32.vlgmr.msra.gmra.mrb[0].mxu0 %v47_v33 }
 0x13d   :  { %v191_v41 = vpop.f32.mrb[0].mxu0 }
 0x13e   :  { %v193_v42 = vpop.f32.mrb[1].mxu0  ;;  %v192_v44 = vadd.f32 %v191_v41, %v118_v40 }
 0x13f   :  { %v194_v43 = vadd.f32 %v193_v42, %v122_v39 }
 0x140   :  { %v203_v47 = vmul.f32 %v192_v44, %v192_v44 }
 0x141   :  { %v196_v45 = vand.u32 2147483647, %v194_v43 }
 0x143   :  { %v197_v46 = vsub.f32 0.0, %v196_v45 }
 0x145   :  { %v198_v48 = vmul.f32 0.5, %v197_v46  ;;  %v202_v49 = vadd.f32 1.0, %v197_v46 }
 0x147   :  { %v199_v50 = vmul.f32 1.442695, %v198_v48  ;;  %v204_v51 = vsub.f32 %v202_v49, %v203_v47 }
 0x149   :  { %319 = vpow2.f32 %v199_v50 }
 0x153   :  { %v320_v53 = vpop.eup %319 }
 0x154   :  { %v216_v54 = vmul.f32 %v320_v53, %v215_v52  ;;  %v201_v55 = vmul.f32 %v320_v53, %v320_v53 }
 0x156   :  { %v217_v56 = vadd.f32 %v216_v54, %v192_v44  ;;  %v205_v57 = vsub.f32 %v204_v51, %v201_v55 }
 0x158   :  { %218 = vst [vmem:[#allocation7] sm:$0xff] %v217_v56  ;;  %v212_v58 = vsel %vm211_vm0, %v205_v57, 0.0 }
 0x159   :  { %376 = shalt.err (!%p373_p6)
}
 0x15a   :  { %s377_s26 = scalar_lea.hbm %s525_s4, 128 }
 0x15b   :  { %p378_p7 = scmp.ne.s32.totalorder %s525_s4, %s377_s26  ;;  %p381_p8 = scmp.lt.u32.totalorder %s377_s26, %s525_s4 }
 0x15d   :  { %p383_p9 = pnand %p381_p8, %p378_p7 }
 0x15f   :  { %386 = shalt.err (!%p383_p9)
}
 0x160   :  { %228 = dma.vmem_to_hbm [thread:$0]  %s226_s21, 128, %s525_s4, [#allocation4]   ;;  %214 = vst [vmem:[#allocation8] sm:$0xff] %v212_v58 }
 0x161   :  { %s387_s8 = scalar_lea.vmem %s490_s23, 128  ;;  %p392_p11 = scmp.lt.s32.totalorder %s490_s23, %s490_s23 }
 0x162   :  { %p388_p10 = scmp.ne.s32.totalorder %s490_s23, %s387_s8  ;;  %p393_p12 = scmp.lt.s32.totalorder %s387_s8, %s387_s8 }
 0x164   :  { %p394_p13 = por %p393_p12, %p392_p11 }
 0x166   :  { %p395_p0 = pnand %p394_p13, %p388_p10 }
 0x168   :  { %398 = shalt.err (!%p395_p0)
}
 0x169   :  { %s399_s11 = scalar_lea.hbm %s526_s5, 128 }
 0x16a   :  { %p400_p1 = scmp.ne.s32.totalorder %s526_s5, %s399_s11  ;;  %p403_p2 = scmp.lt.u32.totalorder %s399_s11, %s526_s5 }
 0x16c   :  { %p405_p3 = pnand %p403_p2, %p400_p1 }
 0x16e   :  { %408 = shalt.err (!%p405_p3)
}
 0x16f   :  { %238 = dma.vmem_to_hbm [thread:$0]  %s490_s23, 128, %s526_s5, [#allocation9]  }
 0x170   :  { %413 = dma.done.wait [#allocation4], 128  }
 0x171   :  { %414 = vsyncadd [#allocation4], 4294967168 }
 0x172   :  { %415 = dma.done.wait [#allocation9], 128  }
 0x173   :  { %416 = vsyncadd [#allocation9], 4294967168 }
 0x174   :  { %245 = vsyncpa [#allocation3], 1 }
 0x175   :  { %246 = vsyncpa [#allocation6], 1 }
 0x176   :  { %247 = vsyncpa [#allocation4], 1 }
 0x177   :  { %248 = vsyncpa [#allocation9], 1 }

</bundles_post_ra>
